<compile_context>
chip_gen: v6e
topology: v6e:2x2x1
jax: 0.10.0
libtpu: 0.0.40
codegen_flags: <defaults>
</compile_context>

<pallas_src>
import jax
import jax.numpy as jnp
from jax import lax
from jax.experimental import pallas as pl
from jax.experimental.pallas import tpu as pltpu


# ----------------------------------------------------------------------------
# Kernels
# ----------------------------------------------------------------------------

def _single_k_kernel(x_ref, w_ref, b_ref, o_ref):
    # Whole reduction axis in one block: no accumulator scratch, no RMW.
    z = jnp.dot(x_ref[...], w_ref[...], preferred_element_type=jnp.float32)
    z = z + b_ref[...].astype(jnp.float32)
    o_ref[...] = jax.nn.sigmoid(z).astype(o_ref.dtype)


def _make_multi_k_kernel(k_total, tk):
    """Multi-K-step kernel; masks the ragged K tail in-kernel (no HBM padding)."""
    ragged = (k_total % tk) != 0

    def kernel(x_ref, w_ref, b_ref, o_ref, acc_ref):
        k = pl.program_id(2)
        last = pl.num_programs(2) - 1

        x = x_ref[...]
        w = w_ref[...]
        if ragged:
            # Zero out-of-range K columns/rows (garbage from OOB block reads)
            # so they contribute exactly 0 to the accumulator.
            base = k * tk
            col = base + lax.broadcasted_iota(jnp.int32, x.shape, 1)
            x = jnp.where(col < k_total, x, jnp.zeros_like(x))
            row = base + lax.broadcasted_iota(jnp.int32, w.shape, 0)
            w = jnp.where(row < k_total, w, jnp.zeros_like(w))

        contrib = jnp.dot(x, w, preferred_element_type=jnp.float32)

        @pl.when(k == 0)
        def _():
            acc_ref[...] = contrib          # no zero-init + add pass

        @pl.when(jnp.logical_and(k > 0, k < last))
        def _():
            acc_ref[...] = acc_ref[...] + contrib

        @pl.when(k == last)                 # fold last contribution into output
        def _():
            z = acc_ref[...] + contrib + b_ref[...].astype(jnp.float32)
            o_ref[...] = jax.nn.sigmoid(z).astype(o_ref.dtype)

    return kernel


# ----------------------------------------------------------------------------
# Tile / VMEM selection
# ----------------------------------------------------------------------------

def _vmem_budget_bytes():
    """~75% of physical VMEM: ~96 MiB on v5e/v6e, ~48 MiB on v7x."""
    cap = 64 * 1024 * 1024
    try:
        info = pltpu.get_tpu_info()
        c = getattr(info, "vmem_capacity_bytes", None)
        if c:
            cap = int(c)
    except Exception:
        pass
    return (cap * 3) // 4


def _tile_working_set(tm, tn, tk, in_bytes, out_bytes):
    # double-buffered x / w / bias / out + f32 accumulator
    return ((2 * tm * tk + 2 * tk * tn) * in_bytes
            + 2 * tn * 4
            + 2 * tm * tn * out_bytes
            + tm * tn * 4)


def _auto_tiles(M, N, K, in_bytes, out_bytes, budget):
    def fits(tm, tn, tk):
        return _tile_working_set(tm, tn, tk, in_bytes, out_bytes) <= budget

    tm = M if M <= 256 else 256                       # full dim or 256-aligned
    tn_cands = [N] + [c for c in (512, 256, 128) if c < N]
    tk_cands = [K] + [c for c in (2048, 1024, 512, 256, 128) if c < K]
    # Prefer full-K (single reduction step) and whole-weight-resident (tn=N,
    # tk=K -> weight block index constant, fetched from HBM exactly once).
    for tk_c in tk_cands:
        for tn_c in tn_cands:
            if fits(tm, tn_c, tk_c):
                return tm, tn_c, tk_c
    return tm, min(N, 128), min(K, 128)


# ----------------------------------------------------------------------------
# Wrapper
# ----------------------------------------------------------------------------

def linear_sigmoid(x, weight, bias, *, tm=None, tn=None, tk=None,
                   compute_dtype=jnp.bfloat16):
    """sigmoid(x @ weight.T + bias).

    x:      (M, K)
    weight: (N, K)  -- torch nn.Linear layout
    bias:   (N,)
    """
    M, K = x.shape
    N, Kw = weight.shape
    assert K == Kw, (K, Kw)

    out_dtype = x.dtype
    in_bytes = jnp.dtype(compute_dtype).itemsize
    out_bytes = jnp.dtype(out_dtype).itemsize
    budget = _vmem_budget_bytes()

    tm_e, tn_e, tk_e = _auto_tiles(M, N, K, in_bytes, out_bytes, budget)
    if tm is not None:
        tm_e = min(tm, M)
    if tn is not None:
        tn_e = min(tn, N)
    if tk is not None:
        tk_e = min(tk, K)

    # One-time layout/dtype prep (fused transpose + cast in XLA); canonical
    # (K, N) weight layout for the MXU, bf16 inputs, f32 bias.
    x_c = x.astype(compute_dtype)
    w_c = weight.T.astype(compute_dtype)
    b2 = bias.astype(jnp.float32).reshape(1, N)

    mb = pl.cdiv(M, tm_e)
    nb = pl.cdiv(N, tn_e)
    kb = pl.cdiv(K, tk_e)
    grid = (mb, nb, kb)

    if kb == 1:
        kernel = _single_k_kernel
        scratch = []
    else:
        kernel = _make_multi_k_kernel(K, tk_e)
        scratch = [pltpu.VMEM((tm_e, tn_e), jnp.float32)]

    tile_bytes = _tile_working_set(tm_e, tn_e, tk_e, in_bytes, out_bytes)
    vmem_limit = int(min(max(2 * tile_bytes, 32 * 1024 * 1024), budget))

    return pl.pallas_call(
        kernel,
        out_shape=jax.ShapeDtypeStruct((M, N), out_dtype),
        grid_spec=pltpu.PrefetchScalarGridSpec(
            num_scalar_prefetch=0,
            grid=grid,
            in_specs=[
                pl.BlockSpec((tm_e, tk_e), lambda i, j, k: (i, k)),  # x (M,K)
                pl.BlockSpec((tk_e, tn_e), lambda i, j, k: (k, j)),  # w (K,N)
                pl.BlockSpec((1, tn_e),    lambda i, j, k: (0, j)),  # bias
            ],
            out_specs=pl.BlockSpec((tm_e, tn_e), lambda i, j, k: (i, j)),
            scratch_shapes=scratch,
        ),
        compiler_params=pltpu.CompilerParams(
            dimension_semantics=("parallel", "parallel", "arbitrary"),
            vmem_limit_bytes=vmem_limit),
    )(x_c, w_c, b2)


def _ref(x, weight, bias):
    z = jnp.dot(x, weight.T, precision=lax.Precision.HIGHEST) + bias
    return jax.nn.sigmoid(z)


# ----------------------------------------------------------------------------
# Tests
# ----------------------------------------------------------------------------

if __name__ == "__main__":
    key = jax.random.PRNGKey(0)

    # ---- Case 1: module-implied small shapes, bf16 compute (default) -------
    batch, input_size, output_size = 8, 32, 16
    kx, kw, kb_ = jax.random.split(key, 3)
    x = jax.random.normal(kx, (batch, input_size), dtype=jnp.float32)
    bound = 1.0 / (input_size ** 0.5)
    weight = jax.random.uniform(kw, (output_size, input_size),
                                minval=-bound, maxval=bound, dtype=jnp.float32)
    bias = jax.random.uniform(kb_, (output_size,),
                              minval=-bound, maxval=bound, dtype=jnp.float32)

    out = jax.block_until_ready(linear_sigmoid(x, weight, bias))
    ref = _ref(x, weight, bias)
    assert out.shape == (batch, output_size)
    assert jnp.allclose(out, ref, atol=2e-2, rtol=2e-2), \
        float(jnp.max(jnp.abs(out - ref)))

    # ---- Case 2: tiled + ragged K, f32 compute (exact-path check of the
    #      multi-K accumulator, in-kernel K-tail masking, partial M block) ----
    M2, K2, N2 = 300, 320, 384
    kx2, kw2, kb2 = jax.random.split(jax.random.PRNGKey(1), 3)
    x2 = jax.random.normal(kx2, (M2, K2), dtype=jnp.float32)
    bound2 = 1.0 / (K2 ** 0.5)
    w2 = jax.random.uniform(kw2, (N2, K2),
                            minval=-bound2, maxval=bound2, dtype=jnp.float32)
    b2 = jax.random.uniform(kb2, (N2,),
                            minval=-bound2, maxval=bound2, dtype=jnp.float32)

    out2 = jax.block_until_ready(
        linear_sigmoid(x2, w2, b2, tm=128, tn=128, tk=128,
                       compute_dtype=jnp.float32))
    ref2 = _ref(x2, w2, b2)
    assert out2.shape == (M2, N2)
    assert jnp.allclose(out2, ref2, atol=5e-5, rtol=5e-5), \
        float(jnp.max(jnp.abs(out2 - ref2)))

    # ---- Case 3: same shapes, auto tiles + bf16 compute (weight-resident,
    #      single-K fast path, partial M block) -------------------------------
    out3 = jax.block_until_ready(linear_sigmoid(x2, w2, b2))
    assert out3.shape == (M2, N2)
    assert jnp.allclose(out3, ref2, atol=2e-2, rtol=2e-2), \
        float(jnp.max(jnp.abs(out3 - ref2)))

    print("KERNEL_OK")
</pallas_src>

<mosaic_0001>
module attributes {stable_mosaic.version = 11 : i64} {
  func.func @_single_k_kernel(%arg0: i32, %arg1: i32, %arg2: i32, %arg3: memref<8x32xbf16, #tpu.memory_space<vmem>>, %arg4: memref<32x16xbf16, #tpu.memory_space<vmem>>, %arg5: memref<1x16xf32, #tpu.memory_space<vmem>>, %arg6: memref<8x16xf32, #tpu.memory_space<vmem>>) attributes {dimension_semantics = [#tpu.dimension_semantics<parallel>, #tpu.dimension_semantics<parallel>, #tpu.dimension_semantics<arbitrary>], iteration_bounds = array<i64: 1, 1, 1>, scalar_prefetch = 0 : i64, scratch_operands = 0 : i64, tpu.core_type = #tpu.core_type<tc>, window_params = [{transform_indices = @transform_0, window_bounds = array<i64: 8, 32>}, {transform_indices = @transform_1, window_bounds = array<i64: 32, 16>}, {transform_indices = @transform_2, window_bounds = array<i64: 1, 16>}, {transform_indices = @transform_3, window_bounds = array<i64: 8, 16>}]} {
    %c0 = arith.constant 0 : index
    %c0_0 = arith.constant 0 : index
    %0 = vector.load %arg3[%c0, %c0_0] : memref<8x32xbf16, #tpu.memory_space<vmem>>, vector<8x32xbf16>
    %c0_1 = arith.constant 0 : index
    %c0_2 = arith.constant 0 : index
    %1 = vector.load %arg4[%c0_1, %c0_2] : memref<32x16xbf16, #tpu.memory_space<vmem>>, vector<32x16xbf16>
    %cst = arith.constant dense<0.000000e+00> : vector<8x16xf32>
    %2 = tpu.matmul %0, %1, %cst {dimension_numbers = #tpu.dot_dimension_numbers<[1], [0], [0], [1], [0, 0, 1, 1], [], []>} : vector<8x32xbf16>, vector<32x16xbf16>, vector<8x16xf32> -> vector<8x16xf32>
    %c0_3 = arith.constant 0 : index
    %c0_4 = arith.constant 0 : index
    %3 = vector.load %arg5[%c0_3, %c0_4] : memref<1x16xf32, #tpu.memory_space<vmem>>, vector<1x16xf32>
    %4 = vector.broadcast %3 : vector<1x16xf32> to vector<8x16xf32>
    %5 = arith.addf %2, %4 : vector<8x16xf32>
    %6 = arith.negf %5 : vector<8x16xf32>
    %7 = math.exp %6 : vector<8x16xf32>
    %cst_5 = arith.constant 1.000000e+00 : f32
    %8 = vector.broadcast %cst_5 : f32 to vector<8x16xf32>
    %9 = arith.addf %8, %7 : vector<8x16xf32>
    %10 = arith.divf %8, %9 : vector<8x16xf32>
    %c0_6 = arith.constant 0 : index
    %c0_7 = arith.constant 0 : index
    %11 = vector.load %arg6[%c0_6, %c0_7] : memref<8x16xf32, #tpu.memory_space<vmem>>, vector<8x16xf32>
    tpu.vector_store %arg6[%c0_6, %c0_7], %10 {strides = array<i32>} : memref<8x16xf32, #tpu.memory_space<vmem>>, vector<8x16xf32>,
    return
  }
  func.func @transform_0(%arg0: i32, %arg1: i32, %arg2: i32) -> (i32, i32) {
    %c0_i32 = arith.constant 0 : i32
    return %arg0, %arg2 : i32, i32
  }
  func.func @transform_1(%arg0: i32, %arg1: i32, %arg2: i32) -> (i32, i32) {
    %c0_i32 = arith.constant 0 : i32
    return %arg2, %arg1 : i32, i32
  }
  func.func @transform_2(%arg0: i32, %arg1: i32, %arg2: i32) -> (i32, i32) {
    %c0_i32 = arith.constant 0 : i32
    %c0_i32_0 = arith.constant 0 : i32
    return %c0_i32, %arg1 : i32, i32
  }
  func.func @transform_3(%arg0: i32, %arg1: i32, %arg2: i32) -> (i32, i32) {
    %c0_i32 = arith.constant 0 : i32
    return %arg0, %arg1 : i32, i32
  }
}

</mosaic_0001>

<bundles_post_ra>
// kernel: tpu_custom_call.1
= control target key start
LH: loop header
LB: loop body
LE: loop exit
PB: predicated region body
PF: predicated region fallthrough
CT: control target
= control target key end

     0   :  { %v153_v1 = vmov 0.0   ;;  %vm154_vm0 = vmmov 0   ;;  %s191_s0 = inlined_call_operand.vmem [shape: bf16[8,32], index: 0, kind: input, shape index: {}]   ;;  %s192_s1 = inlined_call_operand.vmem [shape: bf16[32,16], index: 1, kind: input, shape index: {}]   ;;  %s193_s2 = inlined_call_operand.vmem [shape: f32[1,16], index: 2, kind: input, shape index: {}]   ;;  %s194_s3 = inlined_call_operand.hbm [shape: f32[8,16], index: 3, kind: output, shape index: {}]  }
   0x1   :  { %v125_v0 = vld [vmem:[%s192_s1 + $0x8] sm:$0xff]   ;;  %114 = vmatprep.subr.bf16.mxu0 %v153_v1  ;;  %v126_v2 = vld [vmem:[%s192_s1] sm:$0xff]   ;;  %118 = vmatprep.mubr.msk.bf16.mxu0 %vm154_vm0, %v153_v1 }
   0x2   :  { %115 = vmatpush3.bf16.msra.mxu0 %v125_v0 }
   0x3   :  { %116 = vmatprep.subr.bf16.mxu0 %v153_v1 }
   0x4   :  { %8 = vsyncpa [#allocation3], 0  ;;  %v16_v3 = vld [vmem:[%s191_s0] sm:$0xf]  ;;  %vm40_vm1 = vcmask 261120   ;;  %s155_s1 = smov [#allocation2]  }
   0x5   :  { %v106_v4 = vld [vmem:[%s193_s2] ss:$0 sm:$0xff]  ;;  %s98_s20 = sshll.u32 %s155_s1, 4  ;;  %vm90_vm2 = vcmask 130048   ;;  %s99_s20 = int_to_ptr.vmem [resolvable:$true] %s98_s20 }
   0x6   :  { %117 = vmatpush3.bf16.msra.mxu0 %v126_v2  ;;  %s131_s0 = scalar_lea.vmem %s99_s20, 128  ;;  %p136_p1 = scmp.lt.s32.totalorder %s99_s20, %s99_s20 }
   0x7   :  { %p132_p0 = scmp.ne.s32.totalorder %s99_s20, %s131_s0  ;;  %p137_p2 = scmp.lt.s32.totalorder %s131_s0, %s131_s0 }
   0x9   :  { %119 = vmatmul.mubr.msk.bf16.vlgmr.msra.gmra.mxu0 %vm40_vm1, %v16_v3  ;;  %p138_p3 = por %p137_p2, %p136_p1 }
   0xb   :  { %p139_p4 = pnand %p138_p3, %p132_p0 }
  0xc9   :  { %v78_v5 = vpop.f32.mrf.mxu0 }
  0xca   :  { %v79_v6 = vadd.f32 %v106_v4, %v78_v5 }
  0xcb   :  { %v120_v7 = vpop.f32.mrf.mxu0 }
  0xcc   :  { %v110_v8 = vmul.f32 -1.442695, %v79_v6 }
  0xcd   :  { %v81_v9 = vpop.f32.mrf.mxu0 }
  0xce   :  { %127 = vpow2.f32 %v110_v8 }
  0xcf   :  { %v121_v10 = vpop.f32.mrf.mxu0 }
  0xdb   :  { %v128_v11 = vpop.eup %127 }
  0xdc   :  { %v87_v12 = vadd.f32 1.0, %v128_v11 }
  0xde   :  { %129 = vrcp.f32 %v87_v12 }
  0xeb   :  { %v130_v13 = vpop.eup %129 }
  0xec   :  { %91 = vst.msk [vmem:[#allocation2] sm:$0xff] %vm90_vm2, %v130_v13 }
  0xed   :  { %142 = shalt.err (!%p139_p4)
}
  0xee   :  { %101 = dma.vmem_to_hbm [thread:$0]  %s99_s20, 128, %s194_s3, [#allocation3]  }
  0xef   :  { %151 = dma.done.wait [#allocation3], 128  }
  0xf0   :  { %152 = vsyncadd [#allocation3], 4294967168 }
  0xf1   :  { %105 = vsyncpa [#allocation3], 1 }

</bundles_post_ra>
